<compile_context>
chip_gen: v6e
topology: v6e:2x2x1
jax: 0.10.0
libtpu: 0.0.40
codegen_flags: <defaults>
</compile_context>

<pallas_src>
import jax
import jax.numpy as jnp
from jax.experimental import pallas as pl
from jax.experimental.pallas import tpu as pltpu


def add_one_kernel(x_ref, o_ref):
    # Elementwise hot path: single VPU add over the whole VMEM tile.
    o_ref[...] = x_ref[...] + jnp.asarray(1, dtype=x_ref.dtype)


# Inputs whose lane-dense 2D slab is at most this many bytes take the
# single-block (no-grid) path; larger inputs take the tiled parallel-grid path.
_SMALL_LIMIT_BYTES = 2 * 1024 * 1024
_LANES = 128
_TILE_ROWS = 1024  # (1024, 128) f32 tile = 512 KiB per buffer


def forward_test(x, donate_input=False):
    """Pallas equivalent of ForwardTest.forward: output = x + 1."""
    orig_shape = x.shape
    dtype = x.dtype
    total = x.size
    itemsize = jnp.dtype(dtype).itemsize
    sublanes = 16 if itemsize == 2 else 8  # packed sublanes for 2-byte dtypes (v5e note)

    # --- Lay the tensor out as a lane-dense (rows, 128) slab. ---
    rows = pl.cdiv(total, _LANES)
    small = rows * _LANES * itemsize <= _SMALL_LIMIT_BYTES
    row_mult = sublanes if small else _TILE_ROWS
    rows_padded = pl.cdiv(rows, row_mult) * row_mult
    padded_total = rows_padded * _LANES

    x_flat = x.reshape(-1)
    if padded_total != total:
        x_flat = jnp.pad(x_flat, (0, padded_total - total))
    x2d = x_flat.reshape(rows_padded, _LANES)

    # Alias output onto the input HBM buffer only when the caller donates x and
    # no padding re-materialized the buffer.
    alias = {0: 0} if (donate_input and padded_total == total) else {}

    if small:
        # No grid: one block, whole slab resident in VMEM, no pipelining machinery.
        out2d = pl.pallas_call(
            add_one_kernel,
            out_shape=jax.ShapeDtypeStruct((rows_padded, _LANES), dtype),
            in_specs=[pl.BlockSpec(memory_space=pltpu.MemorySpace.VMEM)],
            out_specs=pl.BlockSpec(memory_space=pltpu.MemorySpace.VMEM),
            input_output_aliases=alias,
        )(x2d)
    else:
        # Tiled path for realistic sizes: BlockSpec double-buffers (1024, 128)
        # tiles; "parallel" lets v7x shard the grid across its 2 TensorCores.
        grid = (rows_padded // _TILE_ROWS,)
        out2d = pl.pallas_call(
            add_one_kernel,
            out_shape=jax.ShapeDtypeStruct((rows_padded, _LANES), dtype),
            grid=grid,
            in_specs=[pl.BlockSpec((_TILE_ROWS, _LANES), lambda i: (i, 0))],
            out_specs=pl.BlockSpec((_TILE_ROWS, _LANES), lambda i: (i, 0)),
            compiler_params=pltpu.CompilerParams(
                dimension_semantics=("parallel",),
            ),
            input_output_aliases=alias,
        )(x2d)

    out_flat = out2d.reshape(-1)
    if padded_total != total:
        out_flat = out_flat[:total]
    return out_flat.reshape(orig_shape)


if __name__ == "__main__":
    key = jax.random.PRNGKey(0)
    # Small NCHW-style input consistent with the module's forward (x + 1).
    x = jax.random.normal(key, (2, 4, 16, 16), dtype=jnp.float32)

    y = forward_test(x)
    jax.block_until_ready(y)

    # Correctness check against plain JAX reference.
    ref = x + 1.0
    assert jnp.allclose(y, ref), "mismatch vs reference"

    print("KERNEL_OK")
</pallas_src>

<mosaic_0001>
module attributes {stable_mosaic.version = 11 : i64} {
  func.func @add_one_kernel(%arg0: memref<16x128xf32, #tpu.memory_space<vmem>>, %arg1: memref<16x128xf32, #tpu.memory_space<vmem>>) attributes {dimension_semantics = [], scalar_prefetch = 0 : i64, scratch_operands = 0 : i64, tpu.core_type = #tpu.core_type<tc>} {
    %c0 = arith.constant 0 : index
    %c0_0 = arith.constant 0 : index
    %0 = vector.load %arg0[%c0, %c0_0] : memref<16x128xf32, #tpu.memory_space<vmem>>, vector<16x128xf32>
    %cst = arith.constant 1.000000e+00 : f32
    %1 = vector.broadcast %cst : f32 to vector<16x128xf32>
    %2 = arith.addf %0, %1 : vector<16x128xf32>
    %c0_1 = arith.constant 0 : index
    %c0_2 = arith.constant 0 : index
    %3 = vector.load %arg1[%c0_1, %c0_2] : memref<16x128xf32, #tpu.memory_space<vmem>>, vector<16x128xf32>
    tpu.vector_store %arg1[%c0_1, %c0_2], %2 {strides = array<i32>} : memref<16x128xf32, #tpu.memory_space<vmem>>, vector<16x128xf32>,
    return
  }
}

</mosaic_0001>

<bundles_post_ra>
// kernel: tpu_custom_call.1
= control target key start
LH: loop header
LB: loop body
LE: loop exit
PB: predicated region body
PF: predicated region fallthrough
CT: control target
= control target key end

     0   :  { %6 = vsyncpa [#allocation3], 0  ;;  %s114_s0 = inlined_call_operand.hbm [shape: f32[16,128], index: 0, kind: input, shape index: {}]   ;;  %s115_s1 = inlined_call_operand.hbm [shape: f32[16,128], index: 1, kind: output, shape index: {}]  }
   0x1   :  { %7 = vsyncpa [#allocation4], 0  ;;  %s94_s6 = smov [#allocation2]  }
   0x2   :  { %s13_s7 = sshll.u32 %s94_s6, 4  ;;  %s14_s7 = int_to_ptr.vmem [resolvable:$true] %s13_s7 }
   0x3   :  { %s58_s8 = scalar_lea.vmem %s14_s7, 256  ;;  %p63_p1 = scmp.lt.s32.totalorder %s14_s7, %s14_s7 }
   0x4   :  { %p59_p0 = scmp.ne.s32.totalorder %s14_s7, %s58_s8  ;;  %p64_p2 = scmp.lt.s32.totalorder %s58_s8, %s58_s8 }
   0x6   :  { %p65_p3 = por %p64_p2, %p63_p1 }
   0x8   :  { %p66_p4 = pnand %p65_p3, %p59_p0 }
   0xa   :  { %69 = shalt.err (!%p66_p4)
}
   0xb   :  { %s95_s9 = smov 128   ;;  %s96_s10 = smov 8  }
   0xc   :  { %19 = dma.hbm_to_vmem [thread:$0]  %s114_s0, 256, %s14_s7, [#allocation3], %s95_s9, %s95_s9, %s96_s10  }
   0xd   :  { %90 = dma.done.wait [#allocation3], 256  }
   0xe   :  { %91 = vsyncadd [#allocation3], 4294967040  ;;  %s97_s13 = smov [#allocation5]   ;;  %v23_v0 = vld [vmem:[#allocation2] sm:$0xff]  ;;  %v24_v1 = vld [vmem:[#allocation2 + $0x8] sm:$0xff] }
   0xf   :  { %s34_s14 = sshll.u32 %s97_s13, 4  ;;  %v25_v2 = vadd.f32 1.0, %v23_v0  ;;  %v26_v3 = vadd.f32 1.0, %v24_v1  ;;  %s35_s14 = int_to_ptr.vmem [resolvable:$true] %s34_s14 }
  0x10   :  { %s70_s15 = scalar_lea.vmem %s35_s14, 256  ;;  %p75_p6 = scmp.lt.s32.totalorder %s35_s14, %s35_s14 }
  0x11   :  { %27 = vst [vmem:[#allocation5] sm:$0xff] %v25_v2  ;;  %28 = vst [vmem:[#allocation5 + $0x8] sm:$0xff] %v26_v3  ;;  %p71_p5 = scmp.ne.s32.totalorder %s35_s14, %s70_s15  ;;  %p76_p7 = scmp.lt.s32.totalorder %s70_s15, %s70_s15 }
  0x13   :  { %p77_p8 = por %p76_p7, %p75_p6 }
  0x15   :  { %p78_p9 = pnand %p77_p8, %p71_p5 }
  0x17   :  { %81 = shalt.err (!%p78_p9)
}
  0x18   :  { %40 = dma.vmem_to_hbm [thread:$0]  %s35_s14, 256, %s115_s1, [#allocation4], %s95_s9, %s95_s9, %s96_s10  }
  0x19   :  { %92 = dma.done.wait [#allocation4], 256  }
  0x1a   :  { %93 = vsyncadd [#allocation4], 4294967040 }
  0x1b   :  { %44 = vsyncpa [#allocation3], 1 }
  0x1c   :  { %45 = vsyncpa [#allocation4], 1 }

</bundles_post_ra>
